<compile_context>
chip_gen: v6e
topology: v6e:2x2x1
jax: 0.10.0
libtpu: 0.0.40
codegen_flags: <defaults>
</compile_context>

<pallas_src>
import jax
import jax.numpy as jnp
from jax.experimental import pallas as pl
from jax.experimental.pallas import tpu as pltpu

IMAGE_SIZE = 784
HIDDEN = 256


def _discriminator_kernel(x_ref, w1_ref, b1_ref, w2_ref, b2_ref, o_ref):
    # Layer 1 on the MXU: (tile_b, 784) bf16 @ (784, 256) bf16 -> f32 accumulate.
    h = jnp.dot(x_ref[...], w1_ref[...], preferred_element_type=jnp.float32)
    h = h + b1_ref[...]
    # LeakyReLU(0.2) on the VPU.
    h = jnp.where(h > 0, h, 0.2 * h)
    # Layer 2 off the MXU: elementwise multiply (VPU) + lane reduction (XLU).
    # w2_ref is the transposed weight row (1, 256); b2 is a scalar in SMEM.
    z = jnp.sum(h * w2_ref[...], axis=-1, keepdims=True) + b2_ref[0, 0]
    # Sigmoid (exp routed to the EUP).
    o_ref[...] = 1.0 / (1.0 + jnp.exp(-z))


def discriminator_forward(x, w1, b1, w2, b2, *, tile_b=512):
    """x: (B, 784) f32; w1: (784, 256); b1: (256,); w2: (256, 1); b2: (1,).
    Returns (B, 1) f32 = sigmoid(leaky_relu(x@w1+b1, 0.2) @ w2 + b2)."""
    B = x.shape[0]
    tile_b = min(tile_b, B)            # small batches: one full-array block
    grid = (pl.cdiv(B, tile_b),)

    x_bf16 = x.astype(jnp.bfloat16)
    w1_bf16 = w1.astype(jnp.bfloat16)
    b1_2d = b1.reshape(1, HIDDEN).astype(jnp.float32)
    w2_row = w2.reshape(1, HIDDEN).astype(jnp.float32)   # (1, 256) transposed row
    b2_2d = b2.reshape(1, 1).astype(jnp.float32)

    cost = pl.CostEstimate(
        flops=2 * B * IMAGE_SIZE * HIDDEN + 3 * B * HIDDEN + 4 * B,
        transcendentals=B,
        bytes_accessed=(x_bf16.size * 2 + w1_bf16.size * 2
                        + (b1.size + w2.size + b2.size) * 4 + B * 4),
    )

    return pl.pallas_call(
        _discriminator_kernel,
        out_shape=jax.ShapeDtypeStruct((B, 1), jnp.float32),
        grid=grid,
        in_specs=[
            # x tiles stream through the pipeline (prefetched under compute).
            pl.BlockSpec((tile_b, IMAGE_SIZE), lambda i: (i, 0)),
            # Weights / biases stay VMEM-resident across all grid steps.
            pl.BlockSpec((IMAGE_SIZE, HIDDEN), lambda i: (0, 0)),
            pl.BlockSpec((1, HIDDEN), lambda i: (0, 0)),
            pl.BlockSpec((1, HIDDEN), lambda i: (0, 0)),
            # Scalar output bias lives in SMEM.
            pl.BlockSpec(memory_space=pltpu.MemorySpace.SMEM),
        ],
        out_specs=pl.BlockSpec((tile_b, 1), lambda i: (i, 0)),
        compiler_params=pltpu.CompilerParams(
            dimension_semantics=("parallel",)),
        cost_estimate=cost,
    )(x_bf16, w1_bf16, b1_2d, w2_row, b2_2d)


def init_params(key):
    """Matches PyTorch nn.Linear default init: U(-1/sqrt(fan_in), 1/sqrt(fan_in))."""
    k1, k2, k3, k4 = jax.random.split(key, 4)
    bound1 = 1.0 / jnp.sqrt(jnp.float32(IMAGE_SIZE))
    bound2 = 1.0 / jnp.sqrt(jnp.float32(HIDDEN))
    # Stored as (in, out) for the x @ W layout used in the kernel.
    w1 = jax.random.uniform(k1, (IMAGE_SIZE, HIDDEN), jnp.float32, -bound1, bound1)
    b1 = jax.random.uniform(k2, (HIDDEN,), jnp.float32, -bound1, bound1)
    w2 = jax.random.uniform(k3, (HIDDEN, 1), jnp.float32, -bound2, bound2)
    b2 = jax.random.uniform(k4, (1,), jnp.float32, -bound2, bound2)
    return w1, b1, w2, b2


def reference_forward(x, w1, b1, w2, b2):
    # Mirrors the kernel's bf16 inputs / f32 accumulation for a tight comparison.
    h = jnp.dot(x.astype(jnp.bfloat16), w1.astype(jnp.bfloat16),
                preferred_element_type=jnp.float32) + b1
    h = jnp.where(h > 0, h, 0.2 * h)
    z = jnp.sum(h * w2.reshape(1, HIDDEN), axis=-1, keepdims=True) + b2.reshape(1, 1)
    return jax.nn.sigmoid(z)


if __name__ == "__main__":
    key = jax.random.PRNGKey(0)
    k_params, k_x, k_x2 = jax.random.split(key, 3)
    w1, b1, w2, b2 = init_params(k_params)

    # Small demo batch (single grid step).
    batch = 8
    x = jax.random.normal(k_x, (batch, IMAGE_SIZE), jnp.float32)
    out = jax.block_until_ready(discriminator_forward(x, w1, b1, w2, b2))
    ref = reference_forward(x, w1, b1, w2, b2)
    assert out.shape == (batch, 1), out.shape
    assert jnp.allclose(out, ref, atol=1e-3, rtol=1e-3), (out, ref)

    # Also exercise the batch grid / pipelined path: 3 tiles of 128 rows.
    xb = jax.random.normal(k_x2, (384, IMAGE_SIZE), jnp.float32)
    out_b = jax.block_until_ready(
        discriminator_forward(xb, w1, b1, w2, b2, tile_b=128))
    ref_b = reference_forward(xb, w1, b1, w2, b2)
    assert out_b.shape == (384, 1), out_b.shape
    assert jnp.allclose(out_b, ref_b, atol=1e-3, rtol=1e-3)

    print("KERNEL_OK")
</pallas_src>

<mosaic_0001>
module attributes {stable_mosaic.version = 11 : i64} {
  func.func @_discriminator_kernel(%arg0: i32, %arg1: memref<8x784xbf16, #tpu.memory_space<vmem>>, %arg2: memref<784x256xbf16, #tpu.memory_space<vmem>>, %arg3: memref<1x256xf32, #tpu.memory_space<vmem>>, %arg4: memref<1x256xf32, #tpu.memory_space<vmem>>, %arg5: memref<1x1xf32, #tpu.memory_space<smem>>, %arg6: memref<8x1xf32, #tpu.memory_space<vmem>>) attributes {dimension_semantics = [#tpu.dimension_semantics<parallel>], iteration_bounds = array<i64: 1>, scalar_prefetch = 0 : i64, scratch_operands = 0 : i64, tpu.core_type = #tpu.core_type<tc>, window_params = [{transform_indices = @transform_0, window_bounds = array<i64: 8, 784>}, {pipeline_mode = #tpu.pipeline_mode<synchronous>, transform_indices = @transform_1, window_bounds = array<i64: 784, 256>}, {pipeline_mode = #tpu.pipeline_mode<synchronous>, transform_indices = @transform_2, window_bounds = array<i64: 1, 256>}, {pipeline_mode = #tpu.pipeline_mode<synchronous>, transform_indices = @transform_3, window_bounds = array<i64: 1, 256>}, {transform_indices = @transform_4, window_bounds = array<i64: 1, 1>}, {transform_indices = @transform_5, window_bounds = array<i64: 8, 1>}]} {
    %c0 = arith.constant 0 : index
    %c0_0 = arith.constant 0 : index
    %0 = vector.load %arg1[%c0, %c0_0] : memref<8x784xbf16, #tpu.memory_space<vmem>>, vector<8x784xbf16>
    %c0_1 = arith.constant 0 : index
    %c0_2 = arith.constant 0 : index
    %1 = vector.load %arg2[%c0_1, %c0_2] : memref<784x256xbf16, #tpu.memory_space<vmem>>, vector<784x256xbf16>
    %cst = arith.constant dense<0.000000e+00> : vector<8x256xf32>
    %2 = tpu.matmul %0, %1, %cst {dimension_numbers = #tpu.dot_dimension_numbers<[1], [0], [0], [1], [0, 0, 1, 1], [], []>} : vector<8x784xbf16>, vector<784x256xbf16>, vector<8x256xf32> -> vector<8x256xf32>
    %c0_3 = arith.constant 0 : index
    %c0_4 = arith.constant 0 : index
    %3 = vector.load %arg3[%c0_3, %c0_4] : memref<1x256xf32, #tpu.memory_space<vmem>>, vector<1x256xf32>
    %4 = vector.broadcast %3 : vector<1x256xf32> to vector<8x256xf32>
    %5 = arith.addf %2, %4 : vector<8x256xf32>
    %cst_5 = arith.constant 0.000000e+00 : f32
    %6 = vector.broadcast %cst_5 : f32 to vector<8x256xf32>
    %7 = arith.cmpf ogt, %5, %6 : vector<8x256xf32>
    %cst_6 = arith.constant 2.000000e-01 : f32
    %8 = vector.broadcast %cst_6 : f32 to vector<8x256xf32>
    %9 = arith.mulf %8, %5 : vector<8x256xf32>
    %10 = arith.select %7, %5, %9 : vector<8x256xi1>, vector<8x256xf32>
    %c0_7 = arith.constant 0 : index
    %c0_8 = arith.constant 0 : index
    %11 = vector.load %arg4[%c0_7, %c0_8] : memref<1x256xf32, #tpu.memory_space<vmem>>, vector<1x256xf32>
    %12 = vector.broadcast %11 : vector<1x256xf32> to vector<8x256xf32>
    %13 = arith.mulf %10, %12 : vector<8x256xf32>
    %cst_9 = arith.constant dense<0.000000e+00> : vector<8xf32>
    %14 = vector.multi_reduction <add>, %13, %cst_9 [1] : vector<8x256xf32> to vector<8xf32>
    %15 = vector.shape_cast %14 : vector<8xf32> to vector<8x1xf32>
    %c0_10 = arith.constant 0 : index
    %c0_11 = arith.constant 0 : index
    %16 = memref.load %arg5[%c0_10, %c0_11] : memref<1x1xf32, #tpu.memory_space<smem>>
    %17 = vector.broadcast %16 : f32 to vector<8x1xf32>
    %18 = arith.addf %15, %17 : vector<8x1xf32>
    %cst_12 = arith.constant 0.000000e+00 : f32
    %19 = vector.broadcast %cst_12 : f32 to vector<8x1xf32>
    %20 = arith.subf %19, %18 : vector<8x1xf32>
    %21 = math.exp %20 : vector<8x1xf32>
    %cst_13 = arith.constant 1.000000e+00 : f32
    %22 = vector.broadcast %cst_13 : f32 to vector<8x1xf32>
    %23 = arith.addf %22, %21 : vector<8x1xf32>
    %cst_14 = arith.constant 1.000000e+00 : f32
    %24 = vector.broadcast %cst_14 : f32 to vector<8x1xf32>
    %25 = arith.divf %24, %23 : vector<8x1xf32>
    %c0_15 = arith.constant 0 : index
    %c0_16 = arith.constant 0 : index
    %26 = vector.load %arg6[%c0_15, %c0_16] : memref<8x1xf32, #tpu.memory_space<vmem>>, vector<8x1xf32>
    tpu.vector_store %arg6[%c0_15, %c0_16], %25 {strides = array<i32>} : memref<8x1xf32, #tpu.memory_space<vmem>>, vector<8x1xf32>,
    return
  }
  func.func @transform_0(%arg0: i32) -> (i32, i32) {
    %c0_i32 = arith.constant 0 : i32
    %c0_i32_0 = arith.constant 0 : i32
    return %arg0, %c0_i32 : i32, i32
  }
  func.func @transform_1(%arg0: i32) -> (i32, i32) {
    %c0_i32 = arith.constant 0 : i32
    %c0_i32_0 = arith.constant 0 : i32
    %c0_i32_1 = arith.constant 0 : i32
    return %c0_i32, %c0_i32_0 : i32, i32
  }
  func.func @transform_2(%arg0: i32) -> (i32, i32) {
    %c0_i32 = arith.constant 0 : i32
    %c0_i32_0 = arith.constant 0 : i32
    %c0_i32_1 = arith.constant 0 : i32
    return %c0_i32, %c0_i32_0 : i32, i32
  }
  func.func @transform_3(%arg0: i32) -> (i32, i32) {
    %c0_i32 = arith.constant 0 : i32
    %c0_i32_0 = arith.constant 0 : i32
    %c0_i32_1 = arith.constant 0 : i32
    return %c0_i32, %c0_i32_0 : i32, i32
  }
  func.func @transform_4(%arg0: i32) -> (i32, i32) {
    %c0_i32 = arith.constant 0 : i32
    %c0_i32_0 = arith.constant 0 : i32
    %c0_i32_1 = arith.constant 0 : i32
    return %c0_i32, %c0_i32_0 : i32, i32
  }
  func.func @transform_5(%arg0: i32) -> (i32, i32) {
    %c0_i32 = arith.constant 0 : i32
    %c0_i32_0 = arith.constant 0 : i32
    return %arg0, %c0_i32 : i32, i32
  }
}

</mosaic_0001>

<bundles_post_ra>
// kernel: tpu_custom_call.1
= control target key start
LH: loop header
LB: loop body
LE: loop exit
PB: predicated region body
PF: predicated region fallthrough
CT: control target
= control target key end

     0   :  { %11 = vsyncpa [#allocation4], 0  ;;  %s1256_s0 = inlined_call_operand.hbm [shape: bf16[8,784], index: 0, kind: input, shape index: {}]   ;;  %s1257_s1 = inlined_call_operand.hbm [shape: bf16[784,256], index: 1, kind: input, shape index: {}]   ;;  %s1258_s2 = inlined_call_operand.vmem [shape: f32[1,256], index: 2, kind: input, shape index: {}]   ;;  %s1259_s3 = inlined_call_operand.vmem [shape: f32[1,256], index: 3, kind: input, shape index: {}]   ;;  %s1260_s4 = inlined_call_operand.<no memory space> [shape: f32[1,1], index: 4, kind: input, shape index: {}]   ;;  %s1261_s5 = inlined_call_operand.vmem [shape: f32[8,1], index: 5, kind: output, shape index: {}]  }
   0x1   :  { %12 = vsyncpa [#allocation6], 0  ;;  %s1197_s18 = smov [#allocation3]   ;;  %s1198_s20 = smov [#allocation5]  }
   0x2   :  { %s19_s19 = sshll.u32 %s1197_s18, 4  ;;  %s28_s21 = sshll.u32 %s1198_s20, 4  ;;  %s20_s19 = int_to_ptr.vmem [resolvable:$true] %s19_s19  ;;  %s29_s21 = int_to_ptr.vmem [resolvable:$true] %s28_s21 }
   0x3   :  { %s1161_s22 = scalar_lea.vmem %s20_s19, 448  ;;  %p1166_p1 = scmp.lt.s32.totalorder %s20_s19, %s20_s19 }
   0x4   :  { %p1162_p0 = scmp.ne.s32.totalorder %s20_s19, %s1161_s22  ;;  %p1167_p2 = scmp.lt.s32.totalorder %s1161_s22, %s1161_s22 }
   0x6   :  { %p1168_p3 = por %p1167_p2, %p1166_p1 }
   0x8   :  { %p1169_p4 = pnand %p1168_p3, %p1162_p0 }
   0xa   :  { %1172 = shalt.err (!%p1169_p4)
}
   0xb   :  { %22 = dma.hbm_to_vmem [thread:$0]  %s1256_s0, 448, %s20_s19, [#allocation4]  }
   0xc   :  { %s1181_s25 = scalar_lea.vmem %s29_s21, 12544  ;;  %p1186_p6 = scmp.lt.s32.totalorder %s29_s21, %s29_s21 }
   0xd   :  { %p1182_p5 = scmp.ne.s32.totalorder %s29_s21, %s1181_s25  ;;  %p1187_p7 = scmp.lt.s32.totalorder %s1181_s25, %s1181_s25 }
   0xf   :  { %p1188_p8 = por %p1187_p7, %p1186_p6 }
  0x11   :  { %p1189_p9 = pnand %p1188_p8, %p1182_p5 }
  0x13   :  { %1192 = shalt.err (!%p1189_p9)
}
  0x14   :  { %s1199_s26 = smov 128   ;;  %s1200_s27 = smov 8  }
  0x15   :  { %34 = dma.hbm_to_vmem [thread:$0]  %s1257_s1, 12544, %s29_s21, [#allocation6], %s1199_s26, %s1199_s26, %s1200_s27  }
  0x16   :  { %1193 = dma.done.wait [#allocation4], 448  }
  0x17   :  { %1194 = vsyncadd [#allocation4], 4294966848 }
  0x18   :  { %1195 = dma.done.wait [#allocation6], 12544  }
  0x19   :  { %1196 = vsyncadd [#allocation6], 4294954752  ;;  %v995_v0 = vld [vmem:[#allocation5 + $0x74] ss:$8 sps:$4 sm:$0xff]   ;;  %v997_v1 = vld [vmem:[#allocation5 + $0x70] ss:$8 sps:$4 sm:$0xff]  }
  0x1a   :  { %680 = vmatprep.subr.bf16.mxu0 %v995_v0  ;;  %v998_v2 = vld [vmem:[#allocation5 + $0x174] ss:$8 sps:$4 sm:$0xff]   ;;  %v1000_v3 = vld [vmem:[#allocation5 + $0x170] ss:$8 sps:$4 sm:$0xff]   ;;  %v1001_v4 = vld [vmem:[#allocation5 + $0x64] ss:$8 sps:$4 sm:$0xff]  }
  0x1b   :  { %681 = vmatpush1.bf16.msra.mxu0 %v997_v1  ;;  %v1003_v5 = vld [vmem:[#allocation5 + $0x60] ss:$8 sps:$4 sm:$0xff]   ;;  %721 = vmatprep.subr.bf16.mxu1 %v998_v2  ;;  %v1004_v6 = vld [vmem:[#allocation5 + $0x164] ss:$8 sps:$4 sm:$0xff]   ;;  %v1007_v8 = vld [vmem:[#allocation5 + $0x54] ss:$8 sps:$4 sm:$0xff]  }
  0x1c   :  { %722 = vmatpush1.bf16.msra.mxu1 %v1000_v3  ;;  %682 = vmatprep.subr.bf16.mxu0 %v1001_v4  ;;  %v1006_v7 = vld [vmem:[#allocation5 + $0x160] ss:$8 sps:$4 sm:$0xff]   ;;  %v1009_v9 = vld [vmem:[#allocation5 + $0x50] ss:$8 sps:$4 sm:$0xff]   ;;  %v1010_v10 = vld [vmem:[#allocation5 + $0x154] ss:$8 sps:$4 sm:$0xff]  }
  0x1d   :  { %723 = vmatprep.subr.bf16.mxu1 %v1004_v6  ;;  %v1013_v11 = vld [vmem:[#allocation5 + $0x44] ss:$8 sps:$4 sm:$0xff]   ;;  %v1012_v12 = vld [vmem:[#allocation5 + $0x150] ss:$8 sps:$4 sm:$0xff]   ;;  %v1015_v14 = vld [vmem:[#allocation5 + $0x40] ss:$8 sps:$4 sm:$0xff]  }
  0x1e   :  { %v1016_v13 = vld [vmem:[#allocation5 + $0x144] ss:$8 sps:$4 sm:$0xff]   ;;  %v1019_v15 = vld [vmem:[#allocation5 + $0x34] ss:$8 sps:$4 sm:$0xff]   ;;  %v1018_v16 = vld [vmem:[#allocation5 + $0x140] ss:$8 sps:$4 sm:$0xff]  }
  0x1f   :  { %683 = vmatpush1.bf16.msra.mxu0 %v1003_v5  ;;  %v1022_v17 = vld [vmem:[#allocation5 + $0x134] ss:$8 sps:$4 sm:$0xff]   ;;  %v1021_v18 = vld [vmem:[#allocation5 + $0x30] ss:$8 sps:$4 sm:$0xff]   ;;  %v1025_v19 = vld [vmem:[#allocation5 + $0x24] ss:$8 sps:$4 sm:$0xff]  }
  0x20   :  { %684 = vmatprep.subr.bf16.mxu0 %v1007_v8  ;;  %724 = vmatpush1.bf16.msra.mxu1 %v1006_v7  ;;  %v1024_v20 = vld [vmem:[#allocation5 + $0x130] ss:$8 sps:$4 sm:$0xff]   ;;  %v1028_v21 = vld [vmem:[#allocation5 + $0x124] ss:$8 sps:$4 sm:$0xff]   ;;  %v1027_v22 = vld [vmem:[#allocation5 + $0x20] ss:$8 sps:$4 sm:$0xff]  }
  0x21   :  { %725 = vmatprep.subr.bf16.mxu1 %v1010_v10  ;;  %v1031_v23 = vld [vmem:[#allocation5 + $0x14] ss:$8 sps:$4 sm:$0xff]   ;;  %v1030_v24 = vld [vmem:[#allocation5 + $0x120] ss:$8 sps:$4 sm:$0xff]   ;;  %v1033_v26 = vld [vmem:[#allocation5 + $0x10] ss:$8 sps:$4 sm:$0xff]  }
  0x22   :  { %v1034_v25 = vld [vmem:[#allocation5 + $0x114] ss:$8 sps:$4 sm:$0xff]   ;;  %v1037_v27 = vld [vmem:[#allocation5 + $0x4] ss:$8 sps:$4 sm:$0xff]   ;;  %v1036_v28 = vld [vmem:[#allocation5 + $0x110] ss:$8 sps:$4 sm:$0xff]  }
  0x23   :  { %685 = vmatpush1.bf16.msra.mxu0 %v1009_v9  ;;  %v1040_v29 = vld [vmem:[#allocation5 + $0x104] ss:$8 sps:$4 sm:$0xff]   ;;  %v1039_v30 = vld [vmem:[#allocation5] ss:$8 sps:$4 sm:$0xff]   ;;  %v1043_v31 = vld [vmem:[#allocation5 + $0xf4] ss:$8 sps:$4 sm:$0xff]  }
  0x24   :  { %686 = vmatprep.subr.bf16.mxu0 %v1013_v11  ;;  %726 = vmatpush1.bf16.msra.mxu1 %v1012_v12  ;;  %v1042_v32 = vld [vmem:[#allocation5 + $0x100] ss:$8 sps:$4 sm:$0xff]   ;;  %v1046_v33 = vld [vmem:[#allocation5 + $0x1f4] ss:$8 sps:$4 sm:$0xff]   ;;  %v1045_v34 = vld [vmem:[#allocation5 + $0xf0] ss:$8 sps:$4 sm:$0xff]  }
  0x25   :  { %727 = vmatprep.subr.bf16.mxu1 %v1016_v13  ;;  %v1049_v35 = vld [vmem:[#allocation5 + $0xe4] ss:$8 sps:$4 sm:$0xff]   ;;  %v1048_v36 = vld [vmem:[#allocation5 + $0x1f0] ss:$8 sps:$4 sm:$0xff]   ;;  %v1051_v38 = vld [vmem:[#allocation5 + $0xe0] ss:$8 sps:$4 sm:$0xff]  }
  0x26   :  { %v1052_v37 = vld [vmem:[#allocation5 + $0x1e4] ss:$8 sps:$4 sm:$0xff]   ;;  %v1055_v39 = vld [vmem:[#allocation5 + $0xd4] ss:$8 sps:$4 sm:$0xff]   ;;  %v1054_v40 = vld [vmem:[#allocation5 + $0x1e0] ss:$8 sps:$4 sm:$0xff]  }
  0x27   :  { %687 = vmatpush1.bf16.msra.mxu0 %v1015_v14  ;;  %v1058_v41 = vld [vmem:[#allocation5 + $0x1d4] ss:$8 sps:$4 sm:$0xff]   ;;  %v1057_v42 = vld [vmem:[#allocation5 + $0xd0] ss:$8 sps:$4 sm:$0xff]   ;;  %v1061_v43 = vld [vmem:[#allocation5 + $0xc4] ss:$8 sps:$4 sm:$0xff]  }
  0x28   :  { %688 = vmatprep.subr.bf16.mxu0 %v1019_v15  ;;  %728 = vmatpush1.bf16.msra.mxu1 %v1018_v16  ;;  %v1060_v44 = vld [vmem:[#allocation5 + $0x1d0] ss:$8 sps:$4 sm:$0xff]   ;;  %v1064_v45 = vld [vmem:[#allocation5 + $0x1c4] ss:$8 sps:$4 sm:$0xff]   ;;  %v1063_v47 = vld [vmem:[#allocation5 + $0xc0] ss:$8 sps:$4 sm:$0xff]  }
  0x29   :  { %729 = vmatprep.subr.bf16.mxu1 %v1022_v17  ;;  %v48_v46 = vld [vmem:[#allocation3] sm:$0xff]  ;;  %v1067_v49 = vld [vmem:[#allocation5 + $0xb4] ss:$8 sps:$4 sm:$0xff]   ;;  %v49_v50 = vld [vmem:[#allocation3 + $0x8] sm:$0xff]  ;;  %v1201_v15 = vmov 0   ;;  %vm676_vm0 = vcmask 130048  }
  0x2a   :  { %v885_v48 = vcombine.high %v48_v46, %v48_v46  ;;  %v1066_v51 = vld [vmem:[#allocation5 + $0x1c0] ss:$8 sps:$4 sm:$0xff]   ;;  %v887_v52 = vcombine.high %v49_v50, %v49_v50  ;;  %v1070_v53 = vld [vmem:[#allocation5 + $0x1b4] ss:$8 sps:$4 sm:$0xff]   ;;  %v1069_v54 = vld [vmem:[#allocation5 + $0xb0] ss:$8 sps:$4 sm:$0xff]   ;;  %v884_v5 = vcombine.low %v48_v46, %v48_v46  ;;  %v886_v7 = vcombine.low %v49_v50, %v49_v50 }
  0x2b   :  { %689 = vmatpush1.bf16.msra.mxu0 %v1021_v18  ;;  %v1073_v55 = vld [vmem:[#allocation5 + $0xa4] ss:$8 sps:$4 sm:$0xff]   ;;  %v1072_v56 = vld [vmem:[#allocation5 + $0x1b0] ss:$8 sps:$4 sm:$0xff]   ;;  %v1075_v58 = vld [vmem:[#allocation5 + $0xa0] ss:$8 sps:$4 sm:$0xff]  }
  0x2c   :  { %690 = vmatprep.subr.bf16.mxu0 %v1025_v19  ;;  %730 = vmatpush1.bf16.msra.mxu1 %v1024_v20  ;;  %v1076_v57 = vld [vmem:[#allocation5 + $0x1a4] ss:$8 sps:$4 sm:$0xff]   ;;  %v1079_v59 = vld [vmem:[#allocation5 + $0x94] ss:$8 sps:$4 sm:$0xff]   ;;  %v1078_v60 = vld [vmem:[#allocation5 + $0x1a0] ss:$8 sps:$4 sm:$0xff]  }
  0x2d   :  { %731 = vmatprep.subr.bf16.mxu1 %v1028_v21  ;;  %712 = vmatprep.mubr.bf16.mxu0 %v885_v48  ;;  %v1082_v61 = vld [vmem:[#allocation5 + $0x194] ss:$8 sps:$4 sm:$0xff]   ;;  %v1081_v62 = vld [vmem:[#allocation5 + $0x90] ss:$8 sps:$4 sm:$0xff]   ;;  %v1085_v63 = vld [vmem:[#allocation5 + $0x84] ss:$8 sps:$4 sm:$0xff]  }
  0x2e   :  { %753 = vmatprep.mubr.bf16.mxu1 %v887_v52  ;;  %v1084_v0 = vld [vmem:[#allocation5 + $0x190] ss:$8 sps:$4 sm:$0xff]   ;;  %v1088_v1 = vld [vmem:[#allocation5 + $0x184] ss:$8 sps:$4 sm:$0xff]   ;;  %v1087_v2 = vld [vmem:[#allocation5 + $0x80] ss:$8 sps:$4 sm:$0xff]  }
  0x2f   :  { %691 = vmatpush1.bf16.msra.mxu0 %v1027_v22  ;;  %v1095_v3 = vld [vmem:[#allocation5 + $0x274] ss:$8 sps:$4 sm:$0xff]   ;;  %v1092_v4 = vld [vmem:[#allocation5 + $0x180] ss:$8 sps:$4 sm:$0xff]   ;;  %v1093_v6 = vld [vmem:[#allocation5 + $0x270] ss:$8 sps:$4 sm:$0xff]  }
  0x30   :  { %692 = vmatprep.subr.bf16.mxu0 %v1031_v23  ;;  %732 = vmatpush1.bf16.msra.mxu1 %v1030_v24  ;;  %v1100_v8 = vld [vmem:[#allocation5 + $0x264] ss:$8 sps:$4 sm:$0xff]   ;;  %v1140_v10 = vld [vmem:[#allocation5 + $0x300] ss:$8 sps:$4 sm:$0xff]   ;;  %v1238_v11 = vld [vmem:[#allocation3 + $0x10] sm:$0xff]  ;;  %vm876_vm3 = vcmask 7168  }
  0x31   :  { %733 = vmatprep.subr.bf16.mxu1 %v1034_v25  ;;  %v1142_v9 = vld [vmem:[#allocation5 + $0x304] ss:$8 sps:$4 sm:$0xff]   ;;  %v1098_v12 = vld [vmem:[#allocation5 + $0x260] ss:$8 sps:$4 sm:$0xff]   ;;  %v889_v13 = vcombine.high %v1238_v11, %v1238_v11  ;;  %v1103_v14 = vld [vmem:[#allocation5 + $0x254] ss:$8 sps:$4 sm:$0xff]  }
  0x32   :  { %v1101_v16 = vld [vmem:[#allocation5 + $0x250] ss:$8 sps:$4 sm:$0xff]   ;;  %v1106_v17 = vld [vmem:[#allocation5 + $0x244] ss:$8 sps:$4 sm:$0xff]   ;;  %v1146_v18 = vld [vmem:[#allocation3 + $0x18] ss:$0 sps:$4 sm:$0xff]  }
  0x33   :  { %693 = vmatpush1.bf16.msra.mxu0 %v1033_v26  ;;  %v1104_v19 = vld [vmem:[#allocation5 + $0x240] ss:$8 sps:$4 sm:$0xff]   ;;  %v1109_v20 = vld [vmem:[#allocation5 + $0x234] ss:$8 sps:$4 sm:$0xff]   ;;  %v1107_v21 = vld [vmem:[#allocation5 + $0x230] ss:$8 sps:$4 sm:$0xff]  }
  0x34   :  { %694 = vmatprep.subr.bf16.mxu0 %v1037_v27  ;;  %734 = vmatpush1.bf16.msra.mxu1 %v1036_v28  ;;  %v1112_v22 = vld [vmem:[#allocation5 + $0x224] ss:$8 sps:$4 sm:$0xff]   ;;  %v1110_v23 = vld [vmem:[#allocation5 + $0x220] ss:$8 sps:$4 sm:$0xff]   ;;  %v1115_v24 = vld [vmem:[#allocation5 + $0x214] ss:$8 sps:$4 sm:$0xff]  }
  0x35   :  { %735 = vmatprep.subr.bf16.mxu1 %v1040_v29  ;;  %v1113_v25 = vld [vmem:[#allocation5 + $0x210] ss:$8 sps:$4 sm:$0xff]   ;;  %v1118_v26 = vld [vmem:[#allocation5 + $0x204] ss:$8 sps:$4 sm:$0xff]   ;;  %v1116_v27 = vld [vmem:[#allocation5 + $0x200] ss:$8 sps:$4 sm:$0xff]  }
  0x36   :  { %v1121_v28 = vld [vmem:[#allocation5 + $0x2f4] ss:$8 sps:$4 sm:$0xff]   ;;  %v1119_v29 = vld [vmem:[#allocation5 + $0x2f0] ss:$8 sps:$4 sm:$0xff]  }
  0x37   :  { %695 = vmatpush1.bf16.msra.mxu0 %v1039_v30  ;;  %v1124_v30 = vld [vmem:[#allocation5 + $0x2e4] ss:$8 sps:$4 sm:$0xff]  }
  0x38   :  { %696 = vmatprep.subr.bf16.mxu0 %v1043_v31  ;;  %736 = vmatpush1.bf16.msra.mxu1 %v1042_v32  ;;  %v1122_v31 = vld [vmem:[#allocation5 + $0x2e0] ss:$8 sps:$4 sm:$0xff]   ;;  %v1127_v32 = vld [vmem:[#allocation5 + $0x2d4] ss:$8 sps:$4 sm:$0xff]  }
  0x39   :  { %737 = vmatprep.subr.bf16.mxu1 %v1046_v33  ;;  %v1125_v33 = vld [vmem:[#allocation5 + $0x2d0] ss:$8 sps:$4 sm:$0xff]  }
  0x3b   :  { %697 = vmatpush2.bf16.msra.mxu0 %v1045_v34  ;;  %v1130_v34 = vld [vmem:[#allocation5 + $0x2c4] ss:$8 sps:$4 sm:$0xff]  }
  0x3c   :  { %698 = vmatprep.subr.bf16.mxu0 %v1049_v35  ;;  %738 = vmatpush2.bf16.msra.mxu1 %v1048_v36  ;;  %v1128_v35 = vld [vmem:[#allocation5 + $0x2c0] ss:$8 sps:$4 sm:$0xff]   ;;  %v1133_v36 = vld [vmem:[#allocation5 + $0x2b4] ss:$8 sps:$4 sm:$0xff]  }
  0x3d   :  { %739 = vmatprep.subr.bf16.mxu1 %v1052_v37  ;;  %v1131_v37 = vld [vmem:[#allocation5 + $0x2b0] ss:$8 sps:$4 sm:$0xff]  }
  0x3f   :  { %699 = vmatpush2.bf16.msra.mxu0 %v1051_v38  ;;  %v1136_v38 = vld [vmem:[#allocation5 + $0x2a4] ss:$8 sps:$4 sm:$0xff]  }
  0x40   :  { %700 = vmatprep.subr.bf16.mxu0 %v1055_v39  ;;  %740 = vmatpush2.bf16.msra.mxu1 %v1054_v40  ;;  %v1134_v39 = vld [vmem:[#allocation5 + $0x2a0] ss:$8 sps:$4 sm:$0xff]   ;;  %v1139_v40 = vld [vmem:[#allocation5 + $0x294] ss:$8 sps:$4 sm:$0xff]  }
  0x41   :  { %741 = vmatprep.subr.bf16.mxu1 %v1058_v41  ;;  %v1137_v41 = vld [vmem:[#allocation5 + $0x290] ss:$8 sps:$4 sm:$0xff]  }
  0x43   :  { %701 = vmatpush2.bf16.msra.mxu0 %v1057_v42  ;;  %v1145_v42 = vld [vmem:[#allocation5 + $0x284] ss:$8 sps:$4 sm:$0xff]  }
  0x44   :  { %702 = vmatprep.subr.bf16.mxu0 %v1061_v43  ;;  %742 = vmatpush2.bf16.msra.mxu1 %v1060_v44  ;;  %v1143_v43 = vld [vmem:[#allocation5 + $0x280] ss:$8 sps:$4 sm:$0xff]   ;;  %v888_v44 = vcombine.low %v1238_v11, %v1238_v11 }
  0x45   :  { %743 = vmatprep.subr.bf16.mxu1 %v1064_v45 }
  0x47   :  { %703 = vmatpush2.bf16.msra.mxu0 %v1063_v47 }
  0x48   :  { %704 = vmatprep.subr.bf16.mxu0 %v1067_v49  ;;  %744 = vmatpush2.bf16.msra.mxu1 %v1066_v51 }
  0x49   :  { %745 = vmatprep.subr.bf16.mxu1 %v1070_v53 }
  0x4b   :  { %705 = vmatpush2.bf16.msra.mxu0 %v1069_v54 }
  0x4c   :  { %706 = vmatprep.subr.bf16.mxu0 %v1073_v55  ;;  %746 = vmatpush2.bf16.msra.mxu1 %v1072_v56 }
  0x4d   :  { %747 = vmatprep.subr.bf16.mxu1 %v1076_v57  ;;  %v152_v57 = vlaneseq }
  0x4f   :  { %707 = vmatpush2.bf16.msra.mxu0 %v1075_v58  ;;  %v153_v58 = vshrl.u32 %v152_v57, 7 }
  0x50   :  { %708 = vmatprep.subr.bf16.mxu0 %v1079_v59  ;;  %748 = vmatpush2.bf16.msra.mxu1 %v1078_v60  ;;  %v150_v60 = vld [vmem:[%s1258_s2] sm:$0x3] }
  0x51   :  { %749 = vmatprep.subr.bf16.mxu1 %v1082_v61  ;;  %v154_v59 = vsub.s32 0, %v153_v58  ;;  %v158_v61 = vsub.s32 1, %v153_v58 }
  0x53   :  { %709 = vmatpush2.bf16.msra.mxu0 %v1081_v62  ;;  %v155_v62 = vrot.slane %v150_v60, %v154_v59 }
  0x54   :  { %710 = vmatprep.subr.bf16.mxu0 %v1085_v63  ;;  %750 = vmatpush2.bf16.msra.mxu1 %v1084_v0  ;;  %v159_v63 = vrot.slane %v150_v60, %v158_v61 }
  0x55   :  { %751 = vmatprep.subr.bf16.mxu1 %v1088_v1 }
  0x57   :  { %711 = vmatpush2.bf16.msra.mxu0 %v1087_v2 }
  0x58   :  { %762 = vmatprep.subr.bf16.mxu0 %v1095_v3  ;;  %752 = vmatpush2.bf16.msra.mxu1 %v1092_v4 }
  0x59   :  { %817 = vmatprep.subr.bf16.mxu1 %v1142_v9  ;;  %v850_v9 = vld [vmem:[%s1259_s3] sm:$0x3] }
  0x5a   :  { %713 = vmatmul.mubr.bf16.vlgmr.msra.gmra.mxu0 %v884_v5 }
  0x5b   :  { %763 = vmatpush1.bf16.msra.mxu0 %v1093_v6  ;;  %754 = vmatmul.mubr.bf16.vlgmr.msra.gmra.mxu1 %v886_v7 }
  0x5c   :  { %764 = vmatprep.subr.bf16.mxu0 %v1100_v8  ;;  %818 = vmatpush1.bf16.msra.mxu1 %v1140_v10 }
  0x5d   :  { %835 = vmatprep.mubr.bf16.mxu1 %v1201_v15  ;;  %794 = vmatprep.mubr.bf16.mxu0 %v889_v13  ;;  %v859_v15 = vrot.slane %v850_v9, %v158_v61 }
  0x5f   :  { %765 = vmatpush1.bf16.msra.mxu0 %v1098_v12 }
  0x60   :  { %766 = vmatprep.subr.bf16.mxu0 %v1103_v14  ;;  %v855_v14 = vrot.slane %v850_v9, %v154_v59 }
  0x63   :  { %767 = vmatpush1.bf16.msra.mxu0 %v1101_v16  ;;  %989 = vmatmul.mubr.msk.bf16.vlgmr.msra.gmra.mxu1 %vm676_vm0, %v1146_v18 }
  0x64   :  { %768 = vmatprep.subr.bf16.mxu0 %v1106_v17 }
  0x67   :  { %769 = vmatpush1.bf16.msra.mxu0 %v1104_v19 }
  0x68   :  { %770 = vmatprep.subr.bf16.mxu0 %v1109_v20 }
  0x6b   :  { %771 = vmatpush1.bf16.msra.mxu0 %v1107_v21 }
  0x6c   :  { %772 = vmatprep.subr.bf16.mxu0 %v1112_v22  ;;  %v868_v22 = vstv %s1260_s4 }
  0x6f   :  { %773 = vmatpush1.bf16.msra.mxu0 %v1110_v23 }
  0x70   :  { %774 = vmatprep.subr.bf16.mxu0 %v1115_v24 }
  0x73   :  { %775 = vmatpush1.bf16.msra.mxu0 %v1113_v25 }
  0x74   :  { %776 = vmatprep.subr.bf16.mxu0 %v1118_v26 }
  0x77   :  { %777 = vmatpush1.bf16.msra.mxu0 %v1116_v27 }
  0x78   :  { %778 = vmatprep.subr.bf16.mxu0 %v1121_v28 }
  0x7b   :  { %779 = vmatpush2.bf16.msra.mxu0 %v1119_v29 }
  0x7c   :  { %780 = vmatprep.subr.bf16.mxu0 %v1124_v30 }
  0x7f   :  { %781 = vmatpush2.bf16.msra.mxu0 %v1122_v31 }
  0x80   :  { %782 = vmatprep.subr.bf16.mxu0 %v1127_v32 }
  0x83   :  { %783 = vmatpush2.bf16.msra.mxu0 %v1125_v33 }
  0x84   :  { %784 = vmatprep.subr.bf16.mxu0 %v1130_v34 }
  0x87   :  { %785 = vmatpush2.bf16.msra.mxu0 %v1128_v35 }
  0x88   :  { %786 = vmatprep.subr.bf16.mxu0 %v1133_v36 }
  0x8b   :  { %787 = vmatpush2.bf16.msra.mxu0 %v1131_v37 }
  0x8c   :  { %788 = vmatprep.subr.bf16.mxu0 %v1136_v38 }
  0x8f   :  { %789 = vmatpush2.bf16.msra.mxu0 %v1134_v39 }
  0x90   :  { %790 = vmatprep.subr.bf16.mxu0 %v1139_v40 }
  0x93   :  { %791 = vmatpush2.bf16.msra.mxu0 %v1137_v41 }
  0x94   :  { %792 = vmatprep.subr.bf16.mxu0 %v1145_v42 }
  0x97   :  { %793 = vmatpush2.bf16.msra.mxu0 %v1143_v43 }
  0x9a   :  { %795 = vmatmul.mubr.bf16.vlgmr.msra.gmra.mxu0 %v888_v44 }
 0x11a   :  { %v714_v45 = vpop.f32.mrf.mxu0 }
 0x11b   :  { %v755_v47 = vpop.f32.mrf.mxu1  ;;  %v715_v0 = vadd.f32 %v714_v45, %v155_v62 }
 0x11c   :  { %v716_v46 = vpop.f32.mrf.mxu0 }
 0x11d   :  { %v757_v49 = vpop.f32.mrf.mxu1  ;;  %v717_v1 = vadd.f32 %v716_v46, %v159_v63  ;;  %v756_v2 = vadd.f32 %v755_v47, %v715_v0 }
 0x11e   :  { %v718_v48 = vpop.f32.mrf.mxu0 }
 0x11f   :  { %v759_v51 = vpop.f32.mrf.mxu1  ;;  %v758_v4 = vadd.f32 %v757_v49, %v717_v1 }
 0x120   :  { %v719_v50 = vpop.f32.mrf.mxu0 }
 0x121   :  { %v760_v52 = vpop.f32.mrf.mxu1 }
 0x123   :  { %v837_v53 = vpop.f32.mrf.mxu1 }
 0x125   :  { %v839_v54 = vpop.f32.mrf.mxu1 }
 0x127   :  { %v841_v55 = vpop.f32.mrf.mxu1 }
 0x129   :  { %v842_v56 = vpop.f32.mrf.mxu1 }
 0x15a   :  { %v796_v3 = vpop.f32.mrf.mxu0 }
 0x15b   :  { %v797_v5 = vadd.f32 %v796_v3, %v756_v2 }
 0x15c   :  { %v798_v6 = vpop.f32.mrf.mxu0 }
 0x15d   :  { %v838_v7 = vadd.f32 %v837_v53, %v797_v5  ;;  %v799_v8 = vadd.f32 %v798_v6, %v758_v4 }
 0x15e   :  { %v800_v10 = vpop.f32.mrf.mxu0 }
 0x15f   :  { %v846_v11 = vmul.f32 0.2, %v838_v7  ;;  %v840_v12 = vadd.f32 %v839_v54, %v799_v8  ;;  %vm844_vm1 = vcmp.gt.f32.partialorder %v838_v7, 0.0 }
 0x160   :  { %v801_v13 = vpop.f32.mrf.mxu0 }
 0x161   :  { %v847_v16 = vmul.f32 0.2, %v840_v12  ;;  %vm845_vm2 = vcmp.gt.f32.partialorder %v840_v12, 0.0  ;;  %v848_v17 = vsel %vm844_vm1, %v838_v7, %v846_v11 }
 0x162   :  { %v862_v19 = vmul.f32 %v855_v14, %v848_v17 }
 0x163   :  { %v849_v18 = vsel %vm845_vm2, %v840_v12, %v847_v16 }
 0x164   :  { %v863_v20 = vmul.f32 %v859_v15, %v849_v18 }
 0x166   :  { %v864_v21 = vadd.f32 %v863_v20, %v862_v19 }
 0x168   :  { %865 = vadd.xlane.f32.xlu0 %v864_v21 }
 0x1f1   :  { %v866_v23 = vpop.xlane.xlu0 %865 }
 0x1f2   :  { %v869_v24 = vadd.f32 %v868_v22, %v866_v23 }
 0x1f4   :  { %v870_v25 = vsub.f32 0.0, %v869_v24 }
 0x1f6   :  { %v871_v26 = vmul.f32 1.442695, %v870_v25 }
 0x1f8   :  { %1149 = vpow2.f32 %v871_v26 }
 0x205   :  { %v1150_v27 = vpop.eup %1149 }
 0x206   :  { %v873_v28 = vadd.f32 1.0, %v1150_v27 }
 0x208   :  { %1151 = vrcp.f32 %v873_v28 }
 0x215   :  { %v1152_v29 = vpop.eup %1151 }
 0x216   :  { %877 = vst.msk [vmem:[%s1261_s5] sm:$0xff] %vm876_vm3, %v1152_v29 }
 0x217   :  { %882 = vsyncpa [#allocation4], 1 }
 0x218   :  { %883 = vsyncpa [#allocation6], 1 }

</bundles_post_ra>
